<compile_context>
chip_gen: v5e
topology: v5e:2x2
jax: 0.10.0
libtpu: 0.0.40
codegen_flags: <defaults>
</compile_context>

<pallas_src>
import jax
import jax.numpy as jnp
from jax.experimental import pallas as pl
from jax.experimental.pallas import tpu as pltpu


_TARGET_TILE_BYTES = 2 * 1024 * 1024     # ~1-4 MiB x-tile per grid step -> ~85% HBM roofline
_X_DBUF_VMEM_BUDGET = 12 * 1024 * 1024   # budget for the double-buffered x tile (safe on v5e/v6e/v7x)
_VMEM_LIMIT_BYTES = 32 * 1024 * 1024     # explicit scoped-VMEM limit (<= v7x physical, fine on v5e/v6e)


def _cdiv(a, b):
    return -(-a // b)


def _round_up(a, m):
    return _cdiv(a, m) * m


def _pick_batch_tile(E, itemsize):
    """Byte-targeted, 128-aligned batch tile that fits the VMEM budget."""
    row_bytes = E * itemsize
    tb = max(128, (_TARGET_TILE_BYTES // row_bytes) // 128 * 128)
    # Keep the double-buffered x tile well under the scoped VMEM limit.
    while tb > 128 and 2 * tb * row_bytes > _X_DBUF_VMEM_BUDGET:
        tb = max(128, (tb // 2) // 128 * 128)
    # TODO(synk): for extreme embed_size (>~32K f32) an E-axis reduction grid
    # with a VMEM accumulator would be needed; not required for this module.
    return tb


def _linear_kernel(x_ref, w_ref, b_ref, o_ref):
    # x_ref: (TB, E) VMEM    w_ref: (1, E) VMEM
    # b_ref: (1,)    SMEM    o_ref: (1, TB) VMEM (lane-dense batch row)
    row = jax.lax.dot_general(
        w_ref[...],
        x_ref[...],
        dimension_numbers=(((1,), (1,)), ((), ())),  # contract both E axes: (1,E)x(TB,E)->(1,TB)
        preferred_element_type=jnp.float32,          # f32 accumulation on the MXU
    )
    o_ref[...] = (row + b_ref[0]).astype(o_ref.dtype)


def net_forward(x, w, b):
    """Pallas equivalent of Net.forward: returns x @ W^T + b with shape (B, 1)."""
    B, E = x.shape
    assert w.shape == (1, E)
    assert b.shape == (1,)

    itemsize = jnp.dtype(x.dtype).itemsize
    tb = _pick_batch_tile(E, itemsize)
    out_shape = jax.ShapeDtypeStruct((1, B), x.dtype)

    if B <= tb:
        # Small/medium batch (whole x is at most one byte-targeted tile):
        # single invocation, whole arrays resident in VMEM, scalar bias in
        # SMEM.  No grid / pipeline machinery.
        row = pl.pallas_call(
            _linear_kernel,
            out_shape=out_shape,
            in_specs=[
                pl.BlockSpec(memory_space=pltpu.MemorySpace.VMEM),   # x (B, E)
                pl.BlockSpec(memory_space=pltpu.MemorySpace.VMEM),   # w (1, E)
                pl.BlockSpec(memory_space=pltpu.MemorySpace.SMEM),   # b (1,)
            ],
            out_specs=pl.BlockSpec(memory_space=pltpu.MemorySpace.VMEM),
            compiler_params=pltpu.CompilerParams(
                vmem_limit_bytes=_VMEM_LIMIT_BYTES,
            ),
        )(x, w, b)
    else:
        # Large batch: tile over B, auto-pipelined.  The grid has >= 2 steps
        # by construction; re-divide B into balanced 128-aligned tiles so work
        # splits evenly (on v7x: across both TensorCores).  Non-divisible B is
        # handled by the boundary block (its out-of-range output lanes are
        # never written back), so no padding copy of x is needed.
        nt = _cdiv(B, tb)
        tb = _round_up(_cdiv(B, nt), 128)
        nt = _cdiv(B, tb)
        row = pl.pallas_call(
            _linear_kernel,
            out_shape=out_shape,
            grid=(nt,),
            in_specs=[
                pl.BlockSpec((tb, E), lambda i: (i, 0)),             # x tile
                pl.BlockSpec((1, E), lambda i: (0, 0)),              # w replicated / resident
                pl.BlockSpec(memory_space=pltpu.MemorySpace.SMEM),   # b scalar
            ],
            out_specs=pl.BlockSpec((1, tb), lambda i: (0, i)),       # lane-dense row
            compiler_params=pltpu.CompilerParams(
                dimension_semantics=("parallel",),
                vmem_limit_bytes=_VMEM_LIMIT_BYTES,
            ),
        )(x, w, b)

    # Layout plumbing only: (1, B) row -> (B, 1) column, outside the kernel.
    return row.reshape(B, 1)


if __name__ == "__main__":
    # Small shapes consistent with the module: batch=8, embed_size=32.
    B, E = 8, 32

    key = jax.random.PRNGKey(0)
    kx, kw, kb = jax.random.split(key, 3)

    # Deterministic init (matches nn.Linear's uniform(-1/sqrt(E), 1/sqrt(E)) range).
    bound = 1.0 / (E ** 0.5)
    w = jax.random.uniform(kw, (1, E), jnp.float32, -bound, bound)
    b = jax.random.uniform(kb, (1,), jnp.float32, -bound, bound)

    def ref_fn(xx):
        # Exact-f32 reference (elementwise mul + reduce) so the check does not
        # depend on XLA's default matmul precision.
        return jnp.sum(xx * w, axis=-1, keepdims=True) + b

    # Tolerance sized so the check also passes if the MXU runs f32 matmuls at
    # bf16-pass default precision (E=32 accumulation, f32 accumulator).
    ATOL = RTOL = 1e-2

    # Small batch -> single-shot (no-grid) path.
    x = jax.random.normal(kx, (B, E), jnp.float32)
    out = jax.block_until_ready(net_forward(x, w, b))
    assert out.shape == (B, 1)
    assert jnp.allclose(out, ref_fn(x), atol=ATOL, rtol=RTOL)

    # Tiled, pipelined path: grid > 1, one divisible batch and one ragged
    # (non-divisible) batch to exercise the boundary-block handling.
    for B2 in (49152, 33000):
        x2 = jax.random.normal(kx, (B2, E), jnp.float32)
        out2 = jax.block_until_ready(net_forward(x2, w, b))
        assert out2.shape == (B2, 1)
        assert jnp.allclose(out2, ref_fn(x2), atol=ATOL, rtol=RTOL)

    print("KERNEL_OK")
</pallas_src>

<mosaic_0001>
module attributes {stable_mosaic.version = 11 : i64} {
  func.func @_linear_kernel(%arg0: memref<8x32xf32, #tpu.memory_space<vmem>>, %arg1: memref<1x32xf32, #tpu.memory_space<vmem>>, %arg2: memref<1xf32, #tpu.memory_space<smem>>, %arg3: memref<1x8xf32, #tpu.memory_space<vmem>>) attributes {dimension_semantics = [], scalar_prefetch = 0 : i64, scratch_operands = 0 : i64, tpu.core_type = #tpu.core_type<tc>} {
    %c0 = arith.constant 0 : index
    %c0_0 = arith.constant 0 : index
    %0 = vector.load %arg1[%c0, %c0_0] : memref<1x32xf32, #tpu.memory_space<vmem>>, vector<1x32xf32>
    %c0_1 = arith.constant 0 : index
    %c0_2 = arith.constant 0 : index
    %1 = vector.load %arg0[%c0_1, %c0_2] : memref<8x32xf32, #tpu.memory_space<vmem>>, vector<8x32xf32>
    %cst = arith.constant dense<0.000000e+00> : vector<1x8xf32>
    %2 = tpu.matmul %0, %1, %cst {dimension_numbers = #tpu.dot_dimension_numbers<[1], [1], [0], [0], [0, 0, 1, 0], [], []>} : vector<1x32xf32>, vector<8x32xf32>, vector<1x8xf32> -> vector<1x8xf32>
    %c0_3 = arith.constant 0 : index
    %3 = memref.load %arg2[%c0_3] : memref<1xf32, #tpu.memory_space<smem>>
    %4 = vector.broadcast %3 : f32 to vector<1x8xf32>
    %5 = arith.addf %2, %4 : vector<1x8xf32>
    %c0_4 = arith.constant 0 : index
    %c0_5 = arith.constant 0 : index
    %6 = vector.load %arg3[%c0_4, %c0_5] : memref<1x8xf32, #tpu.memory_space<vmem>>, vector<1x8xf32>
    tpu.vector_store %arg3[%c0_4, %c0_5], %5 {strides = array<i32>} : memref<1x8xf32, #tpu.memory_space<vmem>>, vector<1x8xf32>,
    return
  }
}

</mosaic_0001>

<bundles_post_ra>
// kernel: tpu_custom_call.1
= control target key start
LH: loop header
LB: loop body
LE: loop exit
PB: predicated region body
PF: predicated region fallthrough
CT: control target
= control target key end

     0   :  { %9 = vsyncpa [#allocation4], 0  ;;  %s170_s0 = inlined_call_operand.hbm [shape: f32[8,32], index: 0, kind: input, shape index: {}]   ;;  %s171_s1 = inlined_call_operand.vmem [shape: f32[1,32], index: 1, kind: input, shape index: {}]   ;;  %s172_s2 = inlined_call_operand.<no memory space> [shape: f32[1], index: 2, kind: input, shape index: {}]   ;;  %s173_s3 = inlined_call_operand.hbm [shape: f32[1,8], index: 3, kind: output, shape index: {}]  }
   0x1   :  { %10 = vsyncpa [#allocation5], 0  ;;  %s16_s14 = sshll.u32 %s170_s0, 4  ;;  %s136_s15 = smov [#allocation3]   ;;  %s17_s14 = int_to_ptr.hbm [resolvable:$true] %s16_s14 }
   0x2   :  { %s18_s16 = sshll.u32 %s136_s15, 4  ;;  %s19_s16 = int_to_ptr.vmem [resolvable:$true] %s18_s16 }
   0x3   :  { %21 = dma.hbm_to_vmem [thread:$0]  %s17_s14, 128, %s19_s16, [#allocation4]  }
   0x4   :  { %132 = dma.done.wait [#allocation4], 128  }
   0x5   :  { %133 = vsyncadd [#allocation4], 4294967168  ;;  %vm34_vm0 = vcmask 261120   ;;  %v31_v0 = vld [vmem:[#allocation3] sm:$0xff]  ;;  %v33_v2 = vstv %s172_s2  ;;  %s137_s0 = smov [#allocation6]   ;;  %s70_s24 = sshll.u32 %s173_s3, 4  ;;  %s71_s24 = int_to_ptr.hbm [resolvable:$true] %s70_s24 }
   0x6   :  { %80 = vmatpush.xpose.msk.msra.mxu0 %vm34_vm0, %v31_v0  ;;  %v30_v1 = vld [vmem:[%s171_s1] sm:$0x1]  ;;  %s68_s21 = sshll.u32 %s137_s0, 4  ;;  %vm61_vm1 = vcmask 57344   ;;  %s69_s21 = int_to_ptr.vmem [resolvable:$true] %s68_s21 }
   0x9   :  { %81 = vmatmul.msk.f32.vlgmr.msra.gmra.mxu0 %vm34_vm0, %v30_v1 }
  0x86   :  { %v58_v3 = vpop.f32.mrf.mxu0 }
  0x87   :  { %v59_v4 = vadd.f32 %v58_v3, %v33_v2 }
  0x89   :  { %62 = vst.msk [vmem:[#allocation6] sm:$0x1] %vm61_vm1, %v59_v4 }
  0x8a   :  { %73 = dma.vmem_to_hbm [thread:$0]  %s69_s21, 16, %s71_s24, [#allocation5]  }
  0x8b   :  { %134 = dma.done.wait [#allocation5], 16  }
  0x8c   :  { %135 = vsyncadd [#allocation5], 4294967280 }
  0x8d   :  { %78 = vsyncpa [#allocation4], 1 }
  0x8e   :  { %79 = vsyncpa [#allocation5], 1 }

</bundles_post_ra>
